<compile_context>
chip_gen: v6e
topology: v6e:2x2x1
jax: 0.10.0
libtpu: 0.0.40
codegen_flags: <defaults>
</compile_context>

<pallas_src>
import math
import functools

import numpy as np
import jax
import jax.numpy as jnp
from jax import lax
from jax.experimental import pallas as pl
from jax.experimental.pallas import tpu as pltpu


# ----------------------------------------------------------------------------
# Pallas kernel: one (batch, time-tile) block of the TCNBlock forward.
# ----------------------------------------------------------------------------
def tcn_block_kernel(x_ref, w1_ref, w2_ref, aux_ref, br_ref, out_ref, *,
                     tile_t, pad, dil, ks):
    # x_ref  : (tile_t + 2*pad, Cp)  halo'd, causally zero-padded input window
    # w1_ref : (K*Cp, Cp)            conv1 im2col-stacked effective weights
    # w2_ref : (K*Cp, Cp)            conv2 im2col-stacked effective weights
    # aux_ref: (3, Cp)               rows = [bias1, bias2, residual 1x1 weights]
    # br_ref : (1,) in SMEM          residual conv bias (scalar)
    # out_ref: (tile_t, Cp)
    i = pl.program_id(1)                      # time-tile index

    x = x_ref[...]                            # (tile_t + 2*pad, Cp)
    aux = aux_ref[...]
    b1 = aux[0:1, :]                          # (1, Cp)
    b2 = aux[1:2, :]
    wr = aux[2:3, :]
    br = br_ref[0]

    # --- residual = residual_conv(x): VPU multiply + lane reduction (no MXU) -
    xr = x[2 * pad:, :]                                        # (tile_t, Cp)
    residual = jnp.sum(xr * wr, axis=-1, keepdims=True) + br   # (tile_t, 1)

    # --- conv1 (causal, dilated) as ONE im2col matmul + ReLU ------------------
    h_rows = tile_t + pad        # also produce `pad` rows of h1 history for conv2
    xcat = jnp.concatenate(
        [x[k * dil:k * dil + h_rows, :] for k in range(ks)], axis=-1)
    h1 = jnp.dot(xcat, w1_ref[...], preferred_element_type=jnp.float32) + b1
    h1 = jnp.maximum(h1, 0.0)
    # Rows whose global time index is < 0 must be the *zero padding* the second
    # CausalConv1d sees (not relu(bias)): mask them. Only tile 0 is affected.
    row = lax.broadcasted_iota(jnp.int32, (h_rows, 1), 0)
    h1 = jnp.where(row >= pad - i * tile_t, h1, 0.0)
    # dropout: identity (eval-mode semantics)
    # TODO(synk): training-mode dropout (random masking) not implemented.

    # --- conv2 (causal, dilated) as ONE im2col matmul + ReLU ------------------
    hcat = jnp.concatenate(
        [h1[k * dil:k * dil + tile_t, :] for k in range(ks)], axis=-1)
    h2 = jnp.dot(hcat, w2_ref[...], preferred_element_type=jnp.float32) + b2
    h2 = jnp.maximum(h2, 0.0)
    # dropout: identity (eval-mode semantics)

    # --- out = h2 + residual (broadcast over channels), lane-dense store -----
    out_ref[...] = (h2 + residual).astype(out_ref.dtype)


# ----------------------------------------------------------------------------
# Wrapper: weight-norm, channel padding, halo windows, pallas_call.
# ----------------------------------------------------------------------------
def weight_norm_effective(v, g):
    # v: (O, I, K), g: (O,)  -> w = g * v / ||v||  (norm over all dims but 0)
    norm = jnp.sqrt(jnp.sum(v * v, axis=(1, 2), keepdims=True))
    return g[:, None, None] * v / norm


def tcn_block_forward(x_nct, params, *, kernel_size, dilation, tile_t=None):
    n, c, t = x_nct.shape
    ks, dil = kernel_size, dilation
    pad = (ks - 1) * dil
    cp = ((c + 127) // 128) * 128             # lane-dense channel padding

    if tile_t is None:
        tile_t = min(512, max(8, ((t + 7) // 8) * 8))
    tile_t = max(8, (tile_t // 8) * 8)        # multiple of 8 (sublane tiling)
    t_pad = ((t + tile_t - 1) // tile_t) * tile_t
    num_tiles = t_pad // tile_t
    win_len = tile_t + 2 * pad

    # effective (weight-normed) conv weights, stacked for the im2col matmul
    w1e = weight_norm_effective(params["v1"], params["g1"])   # (C, C, K)
    w2e = weight_norm_effective(params["v2"], params["g2"])

    def stack_weights(w_oik):
        w_kio = jnp.transpose(w_oik, (2, 1, 0)).astype(jnp.float32)  # (K,Ci,Co)
        w_p = jnp.zeros((ks, cp, cp), jnp.float32).at[:, :c, :c].set(w_kio)
        return w_p.reshape(ks * cp, cp)                              # (K*Cp,Cp)

    w1s = stack_weights(w1e)
    w2s = stack_weights(w2e)

    # consolidated small params: one VMEM block + one SMEM scalar
    aux = jnp.zeros((3, cp), jnp.float32)
    aux = aux.at[0, :c].set(params["b1"].astype(jnp.float32))
    aux = aux.at[1, :c].set(params["b2"].astype(jnp.float32))
    aux = aux.at[2, :c].set(params["wr"][0, :, 0].astype(jnp.float32))
    br = params["br"].reshape(1).astype(jnp.float32)

    # (N, C, T) -> (N, T, Cp); causal left zero-pad; overlapping halo windows
    x_ntc = jnp.transpose(x_nct, (0, 2, 1)).astype(jnp.float32)
    x_ntc = jnp.pad(x_ntc, ((0, 0), (0, t_pad - t), (0, cp - c)))
    xp = jnp.pad(x_ntc, ((0, 0), (2 * pad, 0), (0, 0)))       # (N, T_pad+2p, Cp)
    starts = jnp.arange(num_tiles) * tile_t
    win_idx = starts[:, None] + jnp.arange(win_len)[None, :]
    x_win = xp[:, win_idx, :]                                 # (N, nt, win, Cp)

    kernel = functools.partial(tcn_block_kernel, tile_t=tile_t, pad=pad,
                               dil=dil, ks=ks)
    out = pl.pallas_call(
        kernel,
        out_shape=jax.ShapeDtypeStruct((n, t_pad, cp), jnp.float32),
        grid=(n, num_tiles),
        in_specs=[
            pl.BlockSpec((None, None, win_len, cp), lambda b, i: (b, i, 0, 0)),
            pl.BlockSpec((ks * cp, cp), lambda b, i: (0, 0)),
            pl.BlockSpec((ks * cp, cp), lambda b, i: (0, 0)),
            pl.BlockSpec((3, cp), lambda b, i: (0, 0)),
            pl.BlockSpec(memory_space=pltpu.MemorySpace.SMEM),
        ],
        out_specs=pl.BlockSpec((None, tile_t, cp), lambda b, i: (b, i, 0)),
        compiler_params=pltpu.CompilerParams(
            dimension_semantics=("parallel", "parallel"),
            vmem_limit_bytes=32 * 1024 * 1024),
    )(x_win, w1s, w2s, aux, br)

    # drop channel / time padding, back to (N, C, T)
    return jnp.transpose(out[:, :t, :c], (0, 2, 1))


# ----------------------------------------------------------------------------
# Pure-JAX reference (for correctness check)
# ----------------------------------------------------------------------------
def tcn_block_reference(x, params, *, kernel_size, dilation):
    pad = (kernel_size - 1) * dilation
    dn = ("NCH", "OIH", "NCH")
    w1e = weight_norm_effective(params["v1"], params["g1"])
    w2e = weight_norm_effective(params["v2"], params["g2"])

    residual = lax.conv_general_dilated(x, params["wr"], (1,), "VALID",
                                        dimension_numbers=dn) + params["br"][None, :, None]
    xp = jnp.pad(x, ((0, 0), (0, 0), (pad, 0)))
    h1 = jax.nn.relu(lax.conv_general_dilated(xp, w1e, (1,), "VALID",
                                              rhs_dilation=(dilation,),
                                              dimension_numbers=dn)
                     + params["b1"][None, :, None])
    hp = jnp.pad(h1, ((0, 0), (0, 0), (pad, 0)))
    h2 = jax.nn.relu(lax.conv_general_dilated(hp, w2e, (1,), "VALID",
                                              rhs_dilation=(dilation,),
                                              dimension_numbers=dn)
                     + params["b2"][None, :, None])
    return h2 + residual


# ----------------------------------------------------------------------------
if __name__ == "__main__":
    filters, kernel_size, dilation = 8, 3, 2
    batch, seq = 2, 16

    key = jax.random.PRNGKey(0)
    kx, k1, k2, k3, k4, k5, k6 = jax.random.split(key, 7)

    bound = 1.0 / math.sqrt(filters * kernel_size)
    v1 = jax.random.uniform(k1, (filters, filters, kernel_size),
                            minval=-bound, maxval=bound, dtype=jnp.float32)
    b1 = jax.random.uniform(k2, (filters,), minval=-bound, maxval=bound,
                            dtype=jnp.float32)
    v2 = jax.random.uniform(k3, (filters, filters, kernel_size),
                            minval=-bound, maxval=bound, dtype=jnp.float32)
    b2 = jax.random.uniform(k4, (filters,), minval=-bound, maxval=bound,
                            dtype=jnp.float32)
    # weight_norm at init: g = ||v|| per output channel
    g1 = jnp.sqrt(jnp.sum(v1 * v1, axis=(1, 2)))
    g2 = jnp.sqrt(jnp.sum(v2 * v2, axis=(1, 2)))

    bound_r = 1.0 / math.sqrt(filters * 1)
    wr = jax.random.uniform(k5, (1, filters, 1), minval=-bound_r, maxval=bound_r,
                            dtype=jnp.float32)
    br = jax.random.uniform(k6, (1,), minval=-bound_r, maxval=bound_r,
                            dtype=jnp.float32)

    params = dict(v1=v1, g1=g1, b1=b1, v2=v2, g2=g2, b2=b2, wr=wr, br=br)

    x = jax.random.normal(kx, (batch, filters, seq), dtype=jnp.float32)

    # tile_t=8 -> 2 time tiles: exercises both the masked (tile 0) and
    # unmasked halo paths of the gridded kernel.
    out = tcn_block_forward(x, params, kernel_size=kernel_size,
                            dilation=dilation, tile_t=8)
    out = jax.block_until_ready(out)

    ref = tcn_block_reference(x, params, kernel_size=kernel_size,
                              dilation=dilation)
    np.testing.assert_allclose(np.asarray(out), np.asarray(ref),
                               rtol=1e-5, atol=1e-5)
    print("KERNEL_OK")
</pallas_src>

<mosaic_0001>
module attributes {stable_mosaic.version = 11 : i64} {
  func.func @tcn_block_kernel(%arg0: i32, %arg1: i32, %arg2: memref<1x1x16x128xf32, #tpu.memory_space<vmem>>, %arg3: memref<384x128xf32, #tpu.memory_space<vmem>>, %arg4: memref<384x128xf32, #tpu.memory_space<vmem>>, %arg5: memref<3x128xf32, #tpu.memory_space<vmem>>, %arg6: memref<1xf32, #tpu.memory_space<smem>>, %arg7: memref<1x8x128xf32, #tpu.memory_space<vmem>>) attributes {dimension_semantics = [#tpu.dimension_semantics<parallel>, #tpu.dimension_semantics<parallel>], iteration_bounds = array<i64: 2, 2>, scalar_prefetch = 0 : i64, scratch_operands = 0 : i64, tpu.core_type = #tpu.core_type<tc>, window_params = [{transform_indices = @transform_0, window_bounds = array<i64: 1, 1, 16, 128>}, {pipeline_mode = #tpu.pipeline_mode<synchronous>, transform_indices = @transform_1, window_bounds = array<i64: 384, 128>}, {pipeline_mode = #tpu.pipeline_mode<synchronous>, transform_indices = @transform_2, window_bounds = array<i64: 384, 128>}, {pipeline_mode = #tpu.pipeline_mode<synchronous>, transform_indices = @transform_3, window_bounds = array<i64: 3, 128>}, {transform_indices = @transform_4, window_bounds = array<i64: 1>}, {transform_indices = @transform_5, window_bounds = array<i64: 1, 8, 128>}]} {
    %c0 = arith.constant 0 : index
    %c0_0 = arith.constant 0 : index
    %c0_1 = arith.constant 0 : index
    %c0_2 = arith.constant 0 : index
    %0 = vector.load %arg2[%c0, %c0_0, %c0_1, %c0_2] : memref<1x1x16x128xf32, #tpu.memory_space<vmem>>, vector<1x1x16x128xf32>
    %1 = vector.shape_cast %0 : vector<1x1x16x128xf32> to vector<16x128xf32>
    %c0_3 = arith.constant 0 : index
    %c0_4 = arith.constant 0 : index
    %2 = vector.load %arg5[%c0_3, %c0_4] : memref<3x128xf32, #tpu.memory_space<vmem>>, vector<3x128xf32>
    %3 = vector.extract_strided_slice %2 {offsets = [0, 0], sizes = [1, 128], strides = [1, 1]} : vector<3x128xf32> to vector<1x128xf32>
    %4 = vector.extract_strided_slice %2 {offsets = [1, 0], sizes = [1, 128], strides = [1, 1]} : vector<3x128xf32> to vector<1x128xf32>
    %5 = vector.extract_strided_slice %2 {offsets = [2, 0], sizes = [1, 128], strides = [1, 1]} : vector<3x128xf32> to vector<1x128xf32>
    %c0_5 = arith.constant 0 : index
    %6 = memref.load %arg6[%c0_5] : memref<1xf32, #tpu.memory_space<smem>>
    %7 = vector.extract_strided_slice %1 {offsets = [8, 0], sizes = [8, 128], strides = [1, 1]} : vector<16x128xf32> to vector<8x128xf32>
    %8 = vector.broadcast %5 : vector<1x128xf32> to vector<8x128xf32>
    %9 = arith.mulf %7, %8 : vector<8x128xf32>
    %cst = arith.constant dense<0.000000e+00> : vector<8xf32>
    %10 = vector.multi_reduction <add>, %9, %cst [1] : vector<8x128xf32> to vector<8xf32>
    %11 = vector.shape_cast %10 : vector<8xf32> to vector<8x1xf32>
    %12 = vector.broadcast %6 : f32 to vector<8x1xf32>
    %13 = arith.addf %11, %12 : vector<8x1xf32>
    %14 = vector.extract_strided_slice %1 {offsets = [0, 0], sizes = [12, 128], strides = [1, 1]} : vector<16x128xf32> to vector<12x128xf32>
    %15 = vector.extract_strided_slice %1 {offsets = [2, 0], sizes = [12, 128], strides = [1, 1]} : vector<16x128xf32> to vector<12x128xf32>
    %16 = vector.extract_strided_slice %1 {offsets = [4, 0], sizes = [12, 128], strides = [1, 1]} : vector<16x128xf32> to vector<12x128xf32>
    %17 = tpu.concatenate %14, %15, %16 in 1 : vector<12x128xf32>, vector<12x128xf32>, vector<12x128xf32> -> vector<12x384xf32>
    %c0_6 = arith.constant 0 : index
    %c0_7 = arith.constant 0 : index
    %18 = vector.load %arg3[%c0_6, %c0_7] : memref<384x128xf32, #tpu.memory_space<vmem>>, vector<384x128xf32>
    %cst_8 = arith.constant dense<0.000000e+00> : vector<12x128xf32>
    %19 = tpu.matmul %17, %18, %cst_8 {dimension_numbers = #tpu.dot_dimension_numbers<[1], [0], [0], [1], [0, 0, 1, 1], [], []>} : vector<12x384xf32>, vector<384x128xf32>, vector<12x128xf32> -> vector<12x128xf32>
    %20 = vector.broadcast %3 : vector<1x128xf32> to vector<12x128xf32>
    %21 = arith.addf %19, %20 : vector<12x128xf32>
    %cst_9 = arith.constant 0.000000e+00 : f32
    %22 = vector.broadcast %cst_9 : f32 to vector<12x128xf32>
    %23 = arith.maximumf %21, %22 : vector<12x128xf32>
    %24 = tpu.iota {dimensions = array<i32: 0>} : vector<12x1xi32>
    %c8_i32 = arith.constant 8 : i32
    %25 = arith.muli %arg1, %c8_i32 : i32
    %c4_i32 = arith.constant 4 : i32
    %26 = arith.subi %c4_i32, %25 : i32
    %27 = vector.broadcast %26 : i32 to vector<12x1xi32>
    %28 = arith.cmpi sge, %24, %27 : vector<12x1xi32>
    %cst_10 = arith.constant 0.000000e+00 : f32
    %29 = vector.shape_cast %28 : vector<12x1xi1> to vector<12x1xi1>
    %30 = vector.broadcast %29 : vector<12x1xi1> to vector<12x128xi1>
    %31 = vector.broadcast %cst_10 : f32 to vector<12x128xf32>
    %32 = arith.select %30, %23, %31 : vector<12x128xi1>, vector<12x128xf32>
    %33 = vector.extract_strided_slice %32 {offsets = [0, 0], sizes = [8, 128], strides = [1, 1]} : vector<12x128xf32> to vector<8x128xf32>
    %34 = vector.extract_strided_slice %32 {offsets = [2, 0], sizes = [8, 128], strides = [1, 1]} : vector<12x128xf32> to vector<8x128xf32>
    %35 = vector.extract_strided_slice %32 {offsets = [4, 0], sizes = [8, 128], strides = [1, 1]} : vector<12x128xf32> to vector<8x128xf32>
    %36 = tpu.concatenate %33, %34, %35 in 1 : vector<8x128xf32>, vector<8x128xf32>, vector<8x128xf32> -> vector<8x384xf32>
    %c0_11 = arith.constant 0 : index
    %c0_12 = arith.constant 0 : index
    %37 = vector.load %arg4[%c0_11, %c0_12] : memref<384x128xf32, #tpu.memory_space<vmem>>, vector<384x128xf32>
    %cst_13 = arith.constant dense<0.000000e+00> : vector<8x128xf32>
    %38 = tpu.matmul %36, %37, %cst_13 {dimension_numbers = #tpu.dot_dimension_numbers<[1], [0], [0], [1], [0, 0, 1, 1], [], []>} : vector<8x384xf32>, vector<384x128xf32>, vector<8x128xf32> -> vector<8x128xf32>
    %39 = vector.broadcast %4 : vector<1x128xf32> to vector<8x128xf32>
    %40 = arith.addf %38, %39 : vector<8x128xf32>
    %cst_14 = arith.constant 0.000000e+00 : f32
    %41 = vector.broadcast %cst_14 : f32 to vector<8x128xf32>
    %42 = arith.maximumf %40, %41 : vector<8x128xf32>
    %43 = vector.broadcast %13 : vector<8x1xf32> to vector<8x128xf32>
    %44 = arith.addf %42, %43 : vector<8x128xf32>
    %c0_15 = arith.constant 0 : index
    %c0_16 = arith.constant 0 : index
    %c0_17 = arith.constant 0 : index
    %45 = vector.load %arg7[%c0_15, %c0_16, %c0_17] : memref<1x8x128xf32, #tpu.memory_space<vmem>>, vector<1x8x128xf32>
    %46 = vector.shape_cast %45 : vector<1x8x128xf32> to vector<8x128xf32>
    %47 = vector.shape_cast %44 : vector<8x128xf32> to vector<1x8x128xf32>
    tpu.vector_store %arg7[%c0_15, %c0_16, %c0_17], %47 {strides = array<i32>} : memref<1x8x128xf32, #tpu.memory_space<vmem>>, vector<1x8x128xf32>,
    return
  }
  func.func @transform_0(%arg0: i32, %arg1: i32) -> (i32, i32, i32, i32) {
    %c0_i32 = arith.constant 0 : i32
    %c0_i32_0 = arith.constant 0 : i32
    %c0_i32_1 = arith.constant 0 : i32
    return %arg0, %arg1, %c0_i32, %c0_i32_0 : i32, i32, i32, i32
  }
  func.func @transform_1(%arg0: i32, %arg1: i32) -> (i32, i32) {
    %c0_i32 = arith.constant 0 : i32
    %c0_i32_0 = arith.constant 0 : i32
    %c0_i32_1 = arith.constant 0 : i32
    return %c0_i32, %c0_i32_0 : i32, i32
  }
  func.func @transform_2(%arg0: i32, %arg1: i32) -> (i32, i32) {
    %c0_i32 = arith.constant 0 : i32
    %c0_i32_0 = arith.constant 0 : i32
    %c0_i32_1 = arith.constant 0 : i32
    return %c0_i32, %c0_i32_0 : i32, i32
  }
  func.func @transform_3(%arg0: i32, %arg1: i32) -> (i32, i32) {
    %c0_i32 = arith.constant 0 : i32
    %c0_i32_0 = arith.constant 0 : i32
    %c0_i32_1 = arith.constant 0 : i32
    return %c0_i32, %c0_i32_0 : i32, i32
  }
  func.func @transform_4(%arg0: i32, %arg1: i32) -> i32 {
    %c0_i32 = arith.constant 0 : i32
    %c0_i32_0 = arith.constant 0 : i32
    return %c0_i32 : i32
  }
  func.func @transform_5(%arg0: i32, %arg1: i32) -> (i32, i32, i32) {
    %c0_i32 = arith.constant 0 : i32
    %c0_i32_0 = arith.constant 0 : i32
    return %arg0, %arg1, %c0_i32 : i32, i32, i32
  }
}

</mosaic_0001>

<bundles_post_ra>
// kernel: tpu_custom_call.1
= control target key start
LH: loop header
LB: loop body
LE: loop exit
PB: predicated region body
PF: predicated region fallthrough
CT: control target
= control target key end

     0   :  { %s1635_s0 = inlined_call_operand.hbm [shape: f32[2,2,16,128], index: 0, kind: input, shape index: {}]   ;;  %s1636_s1 = inlined_call_operand.hbm [shape: f32[384,128], index: 1, kind: input, shape index: {}]   ;;  %s1637_s2 = inlined_call_operand.hbm [shape: f32[384,128], index: 2, kind: input, shape index: {}]   ;;  %s1638_s3 = inlined_call_operand.vmem [shape: f32[3,128], index: 3, kind: input, shape index: {}]   ;;  %s1639_s4 = inlined_call_operand.<no memory space> [shape: f32[1], index: 4, kind: input, shape index: {}]   ;;  %s1640_s5 = inlined_call_operand.hbm [shape: f32[2,16,128], index: 5, kind: output, shape index: {}]  }
   0x1   :  { %1650 = sst [smem:[#allocation17_spill]] %s1636_s1 }
   0x2   :  { %1651 = sst [smem:[#allocation18_spill]] %s1637_s2 }
   0x3   :  { %1652 = sst [smem:[#allocation19_spill]] %s1640_s5 }
   0x4   :  { %10 = sst [smem:[#allocation2]] %s1639_s4 }
   0x5   :  { %11 = vsyncpa [#allocation4], 0 }
   0x6   :  { %13 = vsyncpa [#allocation4 + $0x1], 0 }
   0x7   :  { %14 = vsyncpa [#allocation7], 0 }
   0x8   :  { %15 = vsyncpa [#allocation5], 0 }
   0x9   :  { %17 = vsyncpa [#allocation5 + $0x1], 0  ;;  %s1388_s20 = smov 0   ;;  %s1390_s21 = smov 0  }
   0xa   :  { %s1392_s22 = smov 0   ;;  %s1394_s23 = smov 0  }
   0xb   :  { %s1396_s24 = smov 0   ;;  %s1398_s25 = smov 0  }
   0xc   :  { %s1400_s26 = smov 0   ;;  %s1402_s4 = smov 0  }
   0xd LB: > { %1653 = sst [smem:[#allocation13_spill]] %s1317_s20  ;;  %s862_s27 = sadd.s32 4294967295, %s1345_s4   ;;  %s1345_s4 = sphi %s1402_s4, %s23_s4   ;;  %s1341_s26 = sphi %s1400_s26, %s1684_s26   ;;  %s1337_s25 = sphi %s1398_s25, %s1683_s25   ;;  %s1333_s24 = sphi %s1396_s24, %s1682_s24   ;;  %s1329_s23 = sphi %s1394_s23, %s1681_s23   ;;  %s1325_s22 = sphi %s1392_s22, %s1680_s22   ;;  %s1321_s21 = sphi %s1390_s21, %s1679_s21   ;;  %s1317_s20 = sphi %s1388_s20, %s1678_s20  }
   0xe   : > { %s863_s28 = sadd.s32 4294967294, %s1345_s4   ;;  %p57_p0 = scmp.ne.s32.totalorder %s1321_s21, %s1317_s20 }
   0xf   : > { %p1432_p1 = scmp.eq.s32.totalorder %s862_s27, 0  ;;  %p1436_p2 = scmp.eq.s32.totalorder %s862_s27, 3 }
  0x10   : > { %p173_p3 = scmp.eq.s32.totalorder %s863_s28, 3  ;;  %p864_p5 = scmp.ge.s32.totalorder %s1345_s4, 1 }
  0x11   : > { %p1442_p4 = por %p1432_p1, %p57_p0  ;;  %p180_p7 = scmp.lt.s32.totalorder %s1345_s4, 5 }
  0x12   : > { %p1447_p6 = por %p173_p3, %p57_p0  ;;  %s1347_s9 = smov [#allocation6]  }
  0x13   : > { %p1452_p8 = pnand %p864_p5, %p180_p7  ;;  %s192_s10 = sshll.u32 %s1347_s9, 4  ;;  %s193_s10 = int_to_ptr.vmem [resolvable:$true] %s192_s10 }
  0x14   : > { %s1657_s7 = scalar_select %p1447_p6, 1, 0 }
  0x15   : > { %p1074_p9 = pneg %p1452_p8  ;;  %s1348_s12 = smov [#allocation8]  }
  0x16   : > { %1658 = sst [smem:[#allocation14_spill]] %s1657_s7  ;;  %s205_s13 = sshll.u32 %s1348_s12, 4  ;;  %s206_s13 = int_to_ptr.vmem [resolvable:$true] %s205_s13 }
  0x17   : > { %p1460_p10 = pnand %p1074_p9, %p1432_p1  ;;  %s1176_s14 = scalar_lea.vmem %s193_s10, 6144 }
  0x18   : > { %p1177_p12 = scmp.ne.s32.totalorder %s193_s10, %s1176_s14  ;;  %p1184_p3 = scmp.lt.s32.totalorder %s193_s10, %s193_s10 }
  0x19   : > { %p1167_p11 = pneg %p1460_p10  ;;  %p1185_p5 = scmp.lt.s32.totalorder %s1176_s14, %s1176_s14 }
  0x1b   : > { %p1179_p13 = pnand %p1177_p12, %p1167_p11  ;;  %p1186_p7 = por %p1185_p5, %p1184_p3 }
  0x1d   : > { %p1180_p0 = pneg %p1179_p13 }
  0x1f   : > { %p1187_p9 = pnand %p1186_p7, %p1180_p0 }
  0x21   : > { %1190 = shalt.err (!%p1187_p9)
}
  0x22   : > { %s1641_s15 = smov 128   ;;  %s1642_s16 = smov 8  }
  0x23   : > { %s1661_s1 = sld [smem:[#allocation17_spill]]  ;;  %s1202_s19 = scalar_lea.vmem %s206_s13, 6144 }
  0x24   : > { %p1203_p12 = scmp.ne.s32.totalorder %s206_s13, %s1202_s19  ;;  %p1210_p0 = scmp.lt.s32.totalorder %s206_s13, %s206_s13 }
  0x25   : > { %p1211_p5 = scmp.lt.s32.totalorder %s1202_s19, %s1202_s19 }
  0x26   : > { %p1205_p13 = pnand %p1203_p12, %p1167_p11 }
  0x27   : > { %p1212_p7 = por %p1211_p5, %p1210_p0 }
  0x28   : > { %p1206_p3 = pneg %p1205_p13 }
  0x29   : > { %1077 = dma.hbm_to_vmem [thread:$0]  (!%p1460_p10), %s1661_s1, 6144, %s193_s10, [#allocation7], %s1641_s15, %s1641_s15, %s1642_s16  }
  0x2a   : > { %p1213_p9 = pnand %p1212_p7, %p1206_p3 }
  0x2c   : > { %1216 = shalt.err (!%p1213_p9)
}
  0x2d   : > { %s1662_s2 = sld [smem:[#allocation18_spill]]  ;;  %s32_s9 = sadd.s32 1, %s1337_s25 }
  0x2e   : > { %s35_s10 = sadd.s32 1, %s1341_s26  ;;  %p33_p11 = scmp.ge.s32.totalorder %s32_s9, 2 }
  0x2f   : > { %s44_s11 = sadd.s32 1, %s1325_s22  ;;  %p51_p12 = scmp.ne.s32.totalorder %s1325_s22, %s1321_s21 }
  0x30   : > { %p52_p13 = scmp.eq.s32.totalorder %s1345_s4, 0  ;;  %s1686_s9 = smov (%p33_p11, %s32_s9), 0 }
  0x31   : > { %1663 = sst [smem:[#allocation15_spill]] %s1686_s9  ;;  %s1688_s10 = smov (!%p33_p11, %s35_s10), %s1341_s26 }
  0x32   : > { %s40_s12 = ssub.s32 %s1337_s25, %s1686_s9  ;;  %p1499_p3 = por %p52_p13, %p51_p12 }
  0x33   : > { %1080 = dma.hbm_to_vmem [thread:$0]  (!%p1460_p10), %s1662_s2, 6144, %s206_s13, [#allocation7], %s1641_s15, %s1641_s15, %s1642_s16  }
  0x34   : > { %p37_p10 = scmp.ge.s32.totalorder %s1688_s10, 2  ;;  %p1505_p0 = por %p1436_p2, %p51_p12 }
  0x35   : > { %p1091_p5 = scmp.lt.s32.totalorder %s1345_s4, 4  ;;  %s225_s17 = sand.u32 1, %s1325_s22  }
  0x36   : > { %s1665_s13 = scalar_select %p1505_p0, 1, 0 }
  0x37   : > { %s1690_s10 = smov (%p37_p10, %s1688_s10), 0  ;;  %s868_s18 = sshll.u32 %s225_s17, 4 }
  0x38   : > { %1666 = sst [smem:[#allocation16_spill]] %s1665_s13  ;;  %s39_s19 = ssub.s32 %s1341_s26, %s1690_s10 }
  0x39   : > { %s41_s27 = sor.u32 %s40_s12, %s39_s19  ;;  %s869_s28 = sshll.u32 %s1337_s25, 1 }
  0x3a   : > { %p42_p7 = scmp.eq.s32.totalorder %s41_s27, 0  ;;  %s870_s15 = sshll.u32 %s1341_s26, 2 }
  0x3b   : > { %s235_s16 = sadd.s32 %s870_s15, %s869_s28  ;;  %s229_s1 = scalar_lea.vmem [#allocation3], %s868_s18 }
  0x3c   : > { %s238_s30 = sshll.u32 %s229_s1, 4  ;;  %s871_s9 = sshll.u32 %s235_s16, 7  ;;  %s239_s30 = int_to_ptr.vmem [resolvable:$true] %s238_s30 }
  0x3d   : > { %s1518_s2 = scalar_select %p42_p7, %s1325_s22, %s44_s11  }
  0x3e   : > { %s237_s5 = scalar_lea.hbm %s1635_s0, %s871_s9  ;;  %p1527_p2 = pnand %p1091_p5, %p1499_p3 }
  0x3f   : > { %s226_s12 = scalar_lea.sflag [#allocation4], %s225_s17  ;;  %s1230_s15 = scalar_lea.vmem %s239_s30, 256 }
  0x40   : > { %p1219_p9 = pneg %p1527_p2  ;;  %p1231_p11 = scmp.ne.s32.totalorder %s239_s30, %s1230_s15 }
  0x41   : > { %s1351_s1 = smov [#allocation3]  }
  0x42   : > { %p1233_p12 = pnand %p1231_p11, %p1219_p9  ;;  %s1235_s16 = sshll.u32 %s1351_s1, 4  ;;  %s1236_s16 = int_to_ptr.vmem [resolvable:$false] %s1235_s16 }
  0x43   : > { %s1237_s11 = scalar_lea.vmem %s1236_s16, 512  ;;  %p1238_p10 = scmp.lt.s32.totalorder %s239_s30, %s1236_s16 }
  0x44   : > { %p1234_p13 = pneg %p1233_p12  ;;  %p1239_p7 = scmp.lt.s32.totalorder %s1237_s11, %s1230_s15 }
  0x46   : > { %p1240_p6 = por %p1239_p7, %p1238_p10 }
  0x48   : > { %p1241_p0 = pnand %p1240_p6, %p1234_p13 }
  0x4a   : > { %1244 = shalt.err (!%p1241_p0)
}
  0x4b   : > { %s1668_s20 = smov 8   ;;  %s1669_s7 = smov 128  }
  0x4c   : > { %1084 = dma.hbm_to_vmem [thread:$0]  (!%p1527_p2), %s237_s5, 256, %s239_s30, %s226_s12, %s1669_s7, %s1669_s7, %s1668_s20  }
  0x4d   : > { %250 = sbr.rel (%p1452_p8) target bundleno = 548 (0x224), region = 40  ;;  %s1541_s9 = sand.u32 (!%p1452_p8), 1, %s1321_s21  }
  0x4e   : > { %s873_s14 = sshll.u32 (!%p1452_p8), %s1541_s9, 4  ;;  %s253_s17 = scalar_lea.sflag (!%p1452_p8), [#allocation4], %s1541_s9 }
  0x4f   : > { %s1545_s18 = scalar_lea.vmem (!%p1452_p8), [#allocation3], %s873_s14 }
  0x52   : > { %1304 = dma.done.wait (%p1442_p4), %s253_s17, 256  }
  0x53   : > { %1306 = vsyncadd (%p1442_p4), %s253_s17, 4294967040 }
  0x54   : > { %1308 = dma.done.wait (%p1432_p1), [#allocation7], 12288  }
  0x55   : > { %1310 = vsyncadd (%p1432_p1), [#allocation7], 4294955008  ;;  %v349_v0 = vld [vmem:[#allocation6 + $0xf8] sm:$0xff]  ;;  %v348_v2 = vld [vmem:[#allocation6 + $0xf0] sm:$0xff]  ;;  %vm306_vm0 = vcmask 1045504   ;;  %vm312_vm1 = vcmask 1043456  }
  0x56   : > { %v333_v1 = vld [vmem:[#allocation6 + $0x78] sm:$0xff]  ;;  %884 = vmatprep.subr.mxu0 %v349_v0  ;;  %v332_v3 = vld [vmem:[#allocation6 + $0x70] sm:$0xff]  ;;  %v347_v5 = vld [vmem:[#allocation6 + $0xe8] sm:$0xff]  ;;  %v1352_v58 = vmov 0.0   ;;  %vm1353_vm2 = vmmov 0   ;;  %s877_s6 = sshll.u32 %s1329_s23, 3 }
  0x57   : > { %v365_v4 = vld [vmem:[#allocation6 + $0x178] sm:$0xff]  ;;  %885 = vmatpush3.msra.mxu0 %v333_v1  ;;  %v364_v6 = vld [vmem:[#allocation6 + $0x170] sm:$0xff]  ;;  %v331_v7 = vld [vmem:[#allocation6 + $0x68] sm:$0xff]  ;;  %s526_s8 = ssub.s32 4, %s877_s6  ;;  %s294_s13 = sld [smem:[#allocation2]] }
  0x58   : > { %992 = vmatprep.subr.mxu1 %v365_v4  ;;  %886 = vmatprep.subr.mxu0 %v348_v2  ;;  %v363_v8 = vld [vmem:[#allocation6 + $0x168] sm:$0xff]  ;;  %v346_v9 = vld [vmem:[#allocation6 + $0xe0] sm:$0xff]  ;;  %v345_v12 = vld [vmem:[#allocation6 + $0xd8] sm:$0xff]  ;;  %s876_s19 = sshll.u32 %s1541_s9, 3  ;;  %s880_s27 = sshll.u32 %s1333_s24, 1 }
  0x59   : > { %993 = vmatpush3.msra.mxu1 %v365_v4  ;;  %887 = vmatpush3.msra.mxu0 %v332_v3  ;;  %v330_v10 = vld [vmem:[#allocation6 + $0x60] sm:$0xff]  ;;  %v329_v13 = vld [vmem:[#allocation6 + $0x58] sm:$0xff]  ;;  %v344_v15 = vld [vmem:[#allocation6 + $0xd0] sm:$0xff]  ;;  %s1670_s28 = sld [smem:[#allocation16_spill]]  ;;  %s753_s30 = sadd.s32 %s1329_s23, %s880_s27 }
  0x5a   : > { %994 = vmatprep.subr.mxu1 %v364_v6  ;;  %888 = vmatprep.subr.mxu0 %v347_v5  ;;  %v362_v11 = vld [vmem:[#allocation6 + $0x160] sm:$0xff]  ;;  %v361_v14 = vld [vmem:[#allocation6 + $0x158] sm:$0xff]  ;;  %v328_v16 = vld [vmem:[#allocation6 + $0x50] sm:$0xff]  ;;  %s881_s12 = sshll.u32 %s753_s30, 7  ;;  %s290_s15 = scalar_lea.vmem [#allocation9], %s876_s19 }
  0x5b   : > { %995 = vmatpush3.msra.mxu1 %v364_v6  ;;  %889 = vmatpush3.msra.mxu0 %v331_v7  ;;  %v360_v17 = vld [vmem:[#allocation6 + $0x150] sm:$0xff]  ;;  %v343_v18 = vld [vmem:[#allocation6 + $0xc8] sm:$0xff]  ;;  %v342_v21 = vld [vmem:[#allocation6 + $0xc0] sm:$0xff]  ;;  %s757_s1 = sshll.u32 %s290_s15, 4  ;;  %s1671_s20 = sld [smem:[#allocation19_spill]]  ;;  %s758_s1 = int_to_ptr.vmem [resolvable:$true] %s757_s1 }
  0x5c   : > { %996 = vmatprep.subr.mxu1 %v363_v8  ;;  %890 = vmatprep.subr.mxu0 %v346_v9  ;;  %v327_v19 = vld [vmem:[#allocation6 + $0x48] sm:$0xff]  ;;  %v326_v22 = vld [vmem:[#allocation6 + $0x40] sm:$0xff]  ;;  %v341_v24 = vld [vmem:[#allocation6 + $0xb8] sm:$0xff]  ;;  %s742_s24 = scalar_lea.sflag [#allocation5], %s1541_s9  ;;  %s1245_s17 = scalar_lea.vmem %s758_s1, 128 }
  0x5d   : > { %997 = vmatpush3.msra.mxu1 %v363_v8  ;;  %891 = vmatpush3.msra.mxu0 %v330_v10  ;;  %v359_v20 = vld [vmem:[#allocation6 + $0x148] sm:$0xff]  ;;  %v358_v23 = vld [vmem:[#allocation6 + $0x140] sm:$0xff]  ;;  %v325_v25 = vld [vmem:[#allocation6 + $0x38] sm:$0xff]  ;;  %p1246_p1 = scmp.ne.s32.totalorder %s758_s1, %s1245_s17  ;;  %s1354_s23 = smov [#allocation9]  }
  0x5e   : > { %998 = vmatprep.subr.mxu1 %v362_v11  ;;  %892 = vmatprep.subr.mxu0 %v345_v12  ;;  %v357_v26 = vld [vmem:[#allocation6 + $0x138] sm:$0xff]  ;;  %v340_v27 = vld [vmem:[#allocation6 + $0xb0] sm:$0xff]  ;;  %v339_v30 = vld [vmem:[#allocation6 + $0xa8] sm:$0xff] }
  0x5f   : > { %999 = vmatpush3.msra.mxu1 %v362_v11  ;;  %893 = vmatpush3.msra.mxu0 %v329_v13  ;;  %v324_v28 = vld [vmem:[#allocation6 + $0x30] sm:$0xff]  ;;  %v323_v31 = vld [vmem:[#allocation6 + $0x28] sm:$0xff]  ;;  %v338_v35 = vld [vmem:[#allocation6 + $0xa0] sm:$0xff]  ;;  %p1673_p4 = scmp.ne.s32.totalorder %s1670_s28, 0 }
  0x60   : > { %1000 = vmatprep.subr.mxu1 %v361_v14  ;;  %894 = vmatprep.subr.mxu0 %v344_v15  ;;  %v356_v29 = vld [vmem:[#allocation6 + $0x130] sm:$0xff]  ;;  %v355_v32 = vld [vmem:[#allocation6 + $0x128] sm:$0xff]  ;;  %v322_v36 = vld [vmem:[#allocation6 + $0x20] sm:$0xff] }
  0x61   : > { %1001 = vmatpush3.msra.mxu1 %v361_v14  ;;  %895 = vmatpush3.msra.mxu0 %v328_v16  ;;  %v291_v33 = vld [vmem:[%s1545_s18] sm:$0xff]  ;;  %v1557_v34 = vld [vmem:[%s1545_s18 + $0x8] sm:$0xff]  ;;  %s1672_s7 = smov %s1671_s20  ;;  %s755_s14 = scalar_lea.hbm %s1671_s20, %s881_s12 }
  0x62   : > { %1002 = vmatprep.subr.mxu1 %v360_v17  ;;  %896 = vmatprep.subr.mxu0 %v343_v18  ;;  %v354_v37 = vld [vmem:[#allocation6 + $0x120] sm:$0xff]  ;;  %v337_v38 = vld [vmem:[#allocation6 + $0x98] sm:$0xff]  ;;  %v307_v39 = vrot.slane %v291_v33, 2  ;;  %v308_v40 = vrot.slane %v1557_v34, 2  ;;  %v336_v43 = vld [vmem:[#allocation6 + $0x90] sm:$0xff]  ;;  %v313_v51 = vrot.slane %v291_v33, 4  ;;  %p1247_p6 = pnand %p1246_p1, %p1673_p4 }
  0x63   : > { %1003 = vmatpush3.msra.mxu1 %v360_v17  ;;  %897 = vmatpush3.msra.mxu0 %v327_v19  ;;  %v321_v41 = vld [vmem:[#allocation6 + $0x18] sm:$0xff]  ;;  %v320_v44 = vld [vmem:[#allocation6 + $0x10] sm:$0xff]  ;;  %v335_v46 = vld [vmem:[#allocation6 + $0x88] sm:$0xff]  ;;  %v314_v52 = vrot.slane %v1557_v34, 4  ;;  %s1249_s18 = sshll.u32 %s1354_s23, 4  ;;  %s1250_s18 = int_to_ptr.vmem [resolvable:$false] %s1249_s18 }
  0x64   : > { %1004 = vmatprep.subr.mxu1 %v359_v20  ;;  %898 = vmatprep.subr.mxu0 %v342_v21  ;;  %v353_v42 = vld [vmem:[#allocation6 + $0x118] sm:$0xff]  ;;  %v352_v45 = vld [vmem:[#allocation6 + $0x110] sm:$0xff]  ;;  %v309_v47 = vsel %vm306_vm0, %v307_v39, %v308_v40  ;;  %v319_v48 = vld [vmem:[#allocation6 + $0x8] sm:$0xff]  ;;  %p1248_p8 = pneg %p1247_p6  ;;  %s1251_s5 = scalar_lea.vmem %s1250_s18, 256 }
  0x65   : > { %1005 = vmatpush3.msra.mxu1 %v359_v20  ;;  %899 = vmatpush3.msra.mxu0 %v326_v22  ;;  %v334_v49 = vld [vmem:[#allocation6 + $0x80] sm:$0xff]  ;;  %v351_v50 = vld [vmem:[#allocation6 + $0x108] sm:$0xff]  ;;  %v315_v55 = vsel %vm312_vm1, %v313_v51, %v314_v52  ;;  %v577_v56 = vld [vmem:[#allocation8 + $0xf8] sm:$0xff]  ;;  %p1252_p3 = scmp.lt.s32.totalorder %s758_s1, %s1250_s18  ;;  %p1253_p0 = scmp.lt.s32.totalorder %s1251_s5, %s1245_s17 }
  0x66   : > { %1006 = vmatprep.subr.mxu1 %v358_v23  ;;  %900 = vmatprep.subr.mxu0 %v341_v24  ;;  %v318_v53 = vld [vmem:[#allocation6] sm:$0xff]  ;;  %v593_v57 = vld [vmem:[#allocation8 + $0x178] sm:$0xff]  ;;  %v576_v60 = vld [vmem:[#allocation8 + $0xf0] sm:$0xff] }
  0x67   : > { %1007 = vmatpush3.msra.mxu1 %v358_v23  ;;  %901 = vmatpush3.msra.mxu0 %v325_v25  ;;  %v350_v54 = vld [vmem:[#allocation6 + $0x100] sm:$0xff]  ;;  %v561_v59 = vld [vmem:[#allocation8 + $0x78] sm:$0xff]  ;;  %v592_v61 = vld [vmem:[#allocation8 + $0x170] sm:$0xff]  ;;  %p1254_p5 = por %p1253_p0, %p1252_p3 }
  0x68   : > { %1008 = vmatprep.subr.mxu1 %v357_v26  ;;  %902 = vmatprep.subr.mxu0 %v340_v27  ;;  %v560_v62 = vld [vmem:[#allocation8 + $0x70] sm:$0xff]  ;;  %v575_v63 = vld [vmem:[#allocation8 + $0xe8] sm:$0xff]  ;;  %v574_v2 = vld [vmem:[#allocation8 + $0xe0] sm:$0xff] }
  0x69   : > { %1009 = vmatpush3.msra.mxu1 %v357_v26  ;;  %903 = vmatpush3.msra.mxu0 %v324_v28  ;;  %v591_v0 = vld [vmem:[#allocation8 + $0x168] sm:$0xff]  ;;  %v590_v3 = vld [vmem:[#allocation8 + $0x160] sm:$0xff]  ;;  %v573_v5 = vld [vmem:[#allocation8 + $0xd8] sm:$0xff]  ;;  %p1255_p2 = pnand %p1254_p5, %p1248_p8 }
  0x6a   : > { %1010 = vmatprep.subr.mxu1 %v356_v29  ;;  %904 = vmatprep.subr.mxu0 %v339_v30  ;;  %v559_v1 = vld [vmem:[#allocation8 + $0x68] sm:$0xff]  ;;  %v558_v4 = vld [vmem:[#allocation8 + $0x60] sm:$0xff]  ;;  %v589_v6 = vld [vmem:[#allocation8 + $0x158] sm:$0xff] }
  0x6b   : > { %1011 = vmatpush3.msra.mxu1 %v356_v29  ;;  %905 = vmatpush3.msra.mxu0 %v323_v31  ;;  %v557_v7 = vld [vmem:[#allocation8 + $0x58] sm:$0xff]  ;;  %v572_v8 = vld [vmem:[#allocation8 + $0xd0] sm:$0xff]  ;;  %v571_v11 = vld [vmem:[#allocation8 + $0xc8] sm:$0xff] }
  0x6c   : > { %1012 = vmatprep.subr.mxu1 %v355_v32  ;;  %906 = vmatprep.subr.mxu0 %v338_v35  ;;  %v588_v9 = vld [vmem:[#allocation8 + $0x150] sm:$0xff]  ;;  %v587_v12 = vld [vmem:[#allocation8 + $0x148] sm:$0xff]  ;;  %v570_v14 = vld [vmem:[#allocation8 + $0xc0] sm:$0xff]  ;;  %v295_v35 = vlaneseq }
  0x6d   : > { %1013 = vmatpush3.msra.mxu1 %v355_v32  ;;  %907 = vmatpush3.msra.mxu0 %v322_v36  ;;  %v556_v10 = vld [vmem:[#allocation8 + $0x50] sm:$0xff]  ;;  %v555_v13 = vld [vmem:[#allocation8 + $0x48] sm:$0xff]  ;;  %v586_v15 = vld [vmem:[#allocation8 + $0x140] sm:$0xff] }
  0x6e   : > { %1014 = vmatprep.subr.mxu1 %v354_v37  ;;  %908 = vmatprep.subr.mxu0 %v337_v38  ;;  %v554_v16 = vld [vmem:[#allocation8 + $0x40] sm:$0xff]  ;;  %v569_v17 = vld [vmem:[#allocation8 + $0xb8] sm:$0xff]  ;;  %v568_v20 = vld [vmem:[#allocation8 + $0xb0] sm:$0xff] }
  0x6f   : > { %1015 = vmatpush3.msra.mxu1 %v354_v37  ;;  %909 = vmatpush3.msra.mxu0 %v321_v41  ;;  %v585_v18 = vld [vmem:[#allocation8 + $0x138] sm:$0xff]  ;;  %v584_v21 = vld [vmem:[#allocation8 + $0x130] sm:$0xff]  ;;  %v567_v23 = vld [vmem:[#allocation8 + $0xa8] sm:$0xff] }
  0x70   : > { %1016 = vmatprep.subr.mxu1 %v353_v42  ;;  %910 = vmatprep.subr.mxu0 %v336_v43  ;;  %v553_v19 = vld [vmem:[#allocation8 + $0x38] sm:$0xff]  ;;  %v552_v22 = vld [vmem:[#allocation8 + $0x30] sm:$0xff]  ;;  %v583_v24 = vld [vmem:[#allocation8 + $0x128] sm:$0xff]  ;;  %v296_v43 = vshrl.u32 %v295_v35, 7 }
  0x71   : > { %1017 = vmatpush3.msra.mxu1 %v353_v42  ;;  %911 = vmatpush3.msra.mxu0 %v320_v44  ;;  %v551_v25 = vld [vmem:[#allocation8 + $0x28] sm:$0xff]  ;;  %v566_v26 = vld [vmem:[#allocation8 + $0xa0] sm:$0xff]  ;;  %v565_v29 = vld [vmem:[#allocation8 + $0x98] sm:$0xff] }
  0x72   : > { %1018 = vmatprep.subr.mxu1 %v352_v45  ;;  %912 = vmatprep.subr.mxu0 %v335_v46  ;;  %v582_v27 = vld [vmem:[#allocation8 + $0x120] sm:$0xff]  ;;  %v581_v30 = vld [vmem:[#allocation8 + $0x118] sm:$0xff]  ;;  %v564_v32 = vld [vmem:[#allocation8 + $0x90] sm:$0xff]  ;;  %v297_v44 = vsub.s32 2, %v296_v43 }
  0x73   : > { %434 = vmatprep.mubr.f32.mxu0 %v309_v47  ;;  %913 = vmatpush3.msra.mxu0 %v319_v48  ;;  %v550_v28 = vld [vmem:[#allocation8 + $0x20] sm:$0xff]  ;;  %v549_v31 = vld [vmem:[#allocation8 + $0x18] sm:$0xff]  ;;  %v548_v36 = vld [vmem:[#allocation8 + $0x10] sm:$0xff]  ;;  %v368_v48 = vsub.s32 0, %v296_v43 }
  0x74   : > { %1019 = vmatpush3.msra.mxu1 %v352_v45  ;;  %914 = vmatprep.subr.mxu0 %v334_v49  ;;  %v563_v37 = vld [vmem:[#allocation8 + $0x88] sm:$0xff]  ;;  %v578_v41 = vld [vmem:[#allocation8 + $0x100] sm:$0xff] }
  0x75   : > { %1020 = vmatprep.subr.mxu1 %v351_v50  ;;  %915 = vmatpush3.msra.mxu0 %v318_v53  ;;  %v579_v38 = vld [vmem:[#allocation8 + $0x108] sm:$0xff]  ;;  %v546_v42 = vld [vmem:[#allocation8] sm:$0xff] }
  0x76   : > { %1021 = vmatpush3.msra.mxu1 %v351_v50  ;;  %435 = vmatmul.mubr.f32.vlgmr.msra.gmra.mxu0 %v291_v33  ;;  %v580_v33 = vld [vmem:[#allocation8 + $0x110] sm:$0xff]  ;;  %v547_v39 = vld [vmem:[#allocation8 + $0x8] sm:$0xff]  ;;  %v293_v45 = vld [vmem:[%s1638_s3] sm:$0x7] }
  0x77   : > { %1022 = vmatprep.subr.mxu1 %v350_v54  ;;  %439 = vmatprep.mubr.f32.mxu0 %v308_v40  ;;  %v562_v40 = vld [vmem:[#allocation8 + $0x80] sm:$0xff]  ;;  %v298_v46 = vrot.slane %v293_v45, %v297_v44  ;;  %v369_v50 = vrot.slane %v293_v45, %v368_v48 }
  0x78   : > { %1023 = vmatpush3.msra.mxu1 %v350_v54  ;;  %1024 = vmatprep.mubr.f32.mxu1 %v315_v55 }
  0x79   : > { %1027 = vmatprep.subr.mxu1 %v1352_v58  ;;  %1025 = vmatmul.mubr.f32.vlgmr.msra.gmra.mxu1 %v314_v52  ;;  %v299_v47 = vmul.f32 %v298_v46, %v1557_v34 }
  0x7a   : > { %940 = vmatprep.subr.mxu0 %v577_v56  ;;  %440 = vmatmul.mubr.f32.gmra.mxu0 %v1557_v34 }
  0x7b   : > { %1028 = vmatpush3.msra.mxu1 %v593_v57  ;;  %941 = vmatpush3.msra.mxu0 %v561_v59 }
  0x7c   : > { %1029 = vmatprep.subr.mxu1 %v1352_v58  ;;  %942 = vmatprep.subr.mxu0 %v576_v60  ;;  %v527_v60 = vstv %s526_s8 }
  0x7d   : > { %1030 = vmatpush3.msra.mxu1 %v592_v61  ;;  %943 = vmatpush3.msra.mxu0 %v560_v62  ;;  %v524_v61 = vadd.s32 8, %v296_v43  ;;  %vm528_vm3 = vcmp.ge.s32.totalorder %v296_v43, %v527_v60 }
  0x7e   : > { %1031 = vmatprep.subr.mxu1 %v1352_v58  ;;  %944 = vmatprep.subr.mxu0 %v575_v63 }
  0x7f   : > { %1032 = vmatpush3.msra.mxu1 %v591_v0  ;;  %945 = vmatpush3.msra.mxu0 %v559_v1  ;;  %vm529_vm4 = vcmp.ge.s32.totalorder %v524_v61, %v527_v60 }
  0x80   : > { %1033 = vmatprep.subr.mxu1 %v1352_v58  ;;  %946 = vmatprep.subr.mxu0 %v574_v2 }
  0x81   : > { %1034 = vmatpush3.msra.mxu1 %v590_v3  ;;  %947 = vmatpush3.msra.mxu0 %v558_v4 }
  0x82   : > { %1035 = vmatprep.subr.mxu1 %v1352_v58  ;;  %948 = vmatprep.subr.mxu0 %v573_v5 }
  0x83   : > { %1036 = vmatpush3.msra.mxu1 %v589_v6  ;;  %949 = vmatpush3.msra.mxu0 %v557_v7 }
  0x84   : > { %1037 = vmatprep.subr.mxu1 %v1352_v58  ;;  %950 = vmatprep.subr.mxu0 %v572_v8 }
  0x85   : > { %1038 = vmatpush3.msra.mxu1 %v588_v9  ;;  %951 = vmatpush3.msra.mxu0 %v556_v10  ;;  %v596_v9 = vsub.s32 1, %v296_v43 }
  0x86   : > { %1039 = vmatprep.subr.mxu1 %v1352_v58  ;;  %952 = vmatprep.subr.mxu0 %v571_v11 }
  0x87   : > { %1040 = vmatpush3.msra.mxu1 %v587_v12  ;;  %953 = vmatpush3.msra.mxu0 %v555_v13  ;;  %v597_v13 = vrot.slane %v293_v45, %v596_v9 }
  0x88   : > { %1041 = vmatprep.subr.mxu1 %v1352_v58  ;;  %954 = vmatprep.subr.mxu0 %v570_v14 }
  0x89   : > { %1042 = vmatpush3.msra.mxu1 %v586_v15  ;;  %955 = vmatpush3.msra.mxu0 %v554_v16 }
  0x8a   : > { %1043 = vmatprep.subr.mxu1 %v1352_v58  ;;  %956 = vmatprep.subr.mxu0 %v569_v17  ;;  %v302_v17 = vstv %s294_s13 }
  0x8b   : > { %1044 = vmatpush3.msra.mxu1 %v585_v18  ;;  %957 = vmatpush3.msra.mxu0 %v553_v19 }
  0x8c   : > { %1045 = vmatprep.subr.mxu1 %v1352_v58  ;;  %958 = vmatprep.subr.mxu0 %v568_v20 }
  0x8d   : > { %1046 = vmatpush3.msra.mxu1 %v584_v21  ;;  %959 = vmatpush3.msra.mxu0 %v552_v22 }
  0x8e   : > { %1047 = vmatprep.subr.mxu1 %v1352_v58  ;;  %960 = vmatprep.subr.mxu0 %v567_v23 }
  0x8f   : > { %1048 = vmatpush3.msra.mxu1 %v583_v24  ;;  %961 = vmatpush3.msra.mxu0 %v551_v25 }
  0x90   : > { %1049 = vmatprep.subr.mxu1 %v1352_v58  ;;  %962 = vmatprep.subr.mxu0 %v566_v26 }
  0x91   : > { %1050 = vmatpush3.msra.mxu1 %v582_v27  ;;  %963 = vmatpush3.msra.mxu0 %v550_v28 }
  0x92   : > { %1051 = vmatprep.subr.mxu1 %v1352_v58  ;;  %964 = vmatprep.subr.mxu0 %v565_v29 }
  0x93   : > { %1052 = vmatpush3.msra.mxu1 %v581_v30  ;;  %965 = vmatpush3.msra.mxu0 %v549_v31 }
  0x94   : > { %1053 = vmatprep.subr.mxu1 %v1352_v58  ;;  %966 = vmatprep.subr.mxu0 %v564_v32 }
  0x95   : > { %1054 = vmatpush3.msra.mxu1 %v580_v33  ;;  %967 = vmatpush3.msra.mxu0 %v548_v36 }
  0x96   : > { %1055 = vmatprep.subr.mxu1 %v1352_v58  ;;  %968 = vmatprep.subr.mxu0 %v563_v37 }
  0x97   : > { %1056 = vmatpush3.msra.mxu1 %v579_v38  ;;  %969 = vmatpush3.msra.mxu0 %v547_v39 }
  0x98   : > { %1057 = vmatprep.subr.mxu1 %v1352_v58  ;;  %970 = vmatprep.subr.mxu0 %v562_v40 }
  0x99   : > { %1058 = vmatpush3.msra.mxu1 %v578_v41  ;;  %1059 = vmatprep.mubr.msk.f32.mxu1 %vm1353_vm2, %v1352_v58 }
  0x9a   : > { %971 = vmatpush3.msra.mxu0 %v546_v42  ;;  %300 = vadd.xlane.f32.xlu0 %v299_v47 }
 0x123   : > { %v301_v16 = vpop.xlane.xlu0 %300 }
 0x124   : > { %v303_v20 = vadd.f32 %v302_v17, %v301_v16 }
 0x136   : > { %v916_v49 = vpop.f32.mrf.mxu0 }
 0x138   : > { %v917_v51 = vpop.f32.mrf.mxu0 }
 0x139   : > { %v918_v52 = vadd.f32 %v917_v51, %v916_v49  ;;  %v1026_v53 = vpop.f32.mrf.mxu1 }
 0x13a   : > { %v919_v54 = vpop.f32.mrf.mxu0 }
 0x13b   : > { %v437_v55 = vadd.f32 %v918_v52, %v369_v50  ;;  %v511_v56 = vpop.f32.mrf.mxu1 }
 0x13c   : > { %v920_v57 = vpop.f32.mrf.mxu0 }
 0x13d   : > { %v921_v58 = vadd.f32 %v920_v57, %v919_v54  ;;  %v512_v59 = vadd.f32 %v511_v56, %v437_v55 }
 0x13f   : > { %v442_v62 = vadd.f32 %v921_v58, %v369_v50  ;;  %v520_v63 = vmax.f32 %v512_v59, 0.0 }
 0x141   : > { %v517_v34 = vadd.f32 %v1026_v53, %v442_v62  ;;  %v534_v1 = vsel %vm528_vm3, %v520_v63, 0.0 }
 0x142   : > { %v538_v3 = vrot.slane %v534_v1, 2  ;;  %v542_v4 = vrot.slane %v534_v1, 4 }
 0x143   : > { %v521_v0 = vmax.f32 %v517_v34, 0.0 }
 0x145   : > { %v535_v2 = vsel %vm529_vm4, %v521_v0, 0.0 }
 0x146   : > { %v539_v5 = vrot.slane %v535_v2, 2  ;;  %v543_v6 = vrot.slane %v535_v2, 4 }
 0x148   : > { %v540_v7 = vsel %vm306_vm0, %v538_v3, %v539_v5  ;;  %v544_v8 = vsel %vm312_vm1, %v542_v4, %v543_v6 }
 0x149   : > { %662 = vmatprep.mubr.f32.mxu0 %v540_v7  ;;  %1060 = vmatmul.mubr.f32.vlgmr.msra.gmra.mxu1 %v544_v8 }
 0x14a   : > { %878 = vmatmul.mubr.msk.f32.vlgmr.msra.gmra.mxu0 %vm528_vm3, %v520_v63 }
 0x209   : > { %v734_v10 = vpop.f32.mrf.mxu1 }
 0x20a   : > { %v972_v11 = vpop.f32.mrf.mxu0 }
 0x20b   : > { %v1061_v12 = vpop.f32.mrf.mxu1 }
 0x20c   : > { %v973_v14 = vpop.f32.mrf.mxu0 }
 0x20d   : > { %v974_v15 = vadd.f32 %v973_v14, %v972_v11 }
 0x20f   : > { %v665_v18 = vadd.f32 %v974_v15, %v597_v13 }
 0x211   : > { %v735_v19 = vadd.f32 %v734_v10, %v665_v18 }
 0x213   : > { %v738_v21 = vmax.f32 %v735_v19, 0.0 }
 0x215   : > { %v739_v22 = vadd.f32 %v738_v21, %v303_v20 }
 0x217   : > { %740 = vst [vmem:[%s290_s15] sm:$0xff] %v739_v22 }
 0x218   : > { %1258 = shalt.err (!%p1255_p2)
}
 0x219   : > { %s1259_s29 = scalar_lea.hbm %s755_s14, 128  ;;  %s1263_s8 = scalar_lea.hbm %s1672_s7, 512 }
 0x21a   : > { %p1260_p9 = scmp.ne.s32.totalorder %s755_s14, %s1259_s29  ;;  %p1264_p13 = scmp.lt.s32.totalorder %s755_s14, %s1672_s7 }
 0x21b   : > { %p1265_p10 = scmp.lt.s32.totalorder %s1263_s8, %s1259_s29 }
 0x21c   : > { %p1261_p11 = pnand %p1260_p9, %p1673_p4 }
 0x21d   : > { %p1266_p7 = por %p1265_p10, %p1264_p13 }
 0x21e   : > { %p1262_p12 = pneg %p1261_p11 }
 0x220   : > { %p1267_p1 = pnand %p1266_p7, %p1262_p12 }
 0x222   : > { %1270 = shalt.err (!%p1267_p1)
}
 0x223   : > { %1072 = dma.vmem_to_hbm [thread:$0]  (%p1673_p4), %s758_s1, 128, %s755_s14, %s742_s24  }
 0x224 PF: > { %s1674_s27 = sld [smem:[#allocation13_spill]]  ;;  %p1094_p6 = scmp.ge.s32.totalorder %s1345_s4, 2 }
 0x225   : > { %s1675_s30 = sld [smem:[#allocation14_spill]] }
 0x22a   : > { %s769_s12 = sand.u32 1, %s1674_s27  }
 0x22b   : > { %p1676_p8 = scmp.ne.s32.totalorder %s1675_s30, 0  ;;  %s770_s15 = scalar_lea.sflag [#allocation5], %s769_s12 }
 0x22d   : > { %p1086_p3 = pnand %p1094_p6, %p1676_p8 }
 0x22f   : > { %p1087_p0 = pneg %p1086_p3 }
 0x231   : > { %1312 = dma.done.wait (%p1087_p0), %s770_s15, 128  }
 0x232   : > { %1314 = vsyncadd (%p1087_p0), %s770_s15, 4294967168  ;;  %s23_s4 = sadd.s32 1, %s1345_s4   ;;  %s1677_s28 = sld [smem:[#allocation15_spill]] }
 0x233   : > { %p20_p5 = scmp.ge.s32.totalorder %s23_s4, 6   ;;  %s1678_s20 = smov %s1321_s21 }
 0x234   : > { %s1679_s21 = smov %s1325_s22  ;;  %s1680_s22 = smov %s1518_s2 }
 0x235   : > { %s1681_s23 = smov %s1337_s25  ;;  %s1682_s24 = smov %s1341_s26 }
 0x236   : > { %s1684_s26 = smov %s1690_s10  ;;  %22 = sbr.rel (!%p20_p5) target bundleno = 13 (0xd), region = 93 }
 0x238   : > { %s1683_s25 = smov %s1677_s28 }
 0x23b   :  { %775 = vsyncpa [#allocation4], 1 }
 0x23c   :  { %777 = vsyncpa [#allocation4 + $0x1], 1 }
 0x23d   :  { %778 = vsyncpa [#allocation7], 1 }
 0x23e   :  { %779 = vsyncpa [#allocation5], 1 }
 0x23f   :  { %781 = vsyncpa [#allocation5 + $0x1], 1 }

</bundles_post_ra>
